<compile_context>
chip_gen: v6e
topology: v6e:2x2x1
jax: 0.10.0
libtpu: 0.0.40
codegen_flags: <defaults>
</compile_context>

<pallas_src>
import jax
import jax.numpy as jnp
from jax.experimental import pallas as pl
from jax.experimental.pallas import tpu as pltpu


def _round_up(x, m):
    return (x + m - 1) // m * m


def _pick_batch_tile(B, N, target_rows=256):
    """Largest TB dividing B with TB*N <= target_rows rows for the MXU, while keeping
    at least 2 grid steps when B >= 2 (so both v7x TensorCores get work)."""
    cap = max(1, target_rows // max(N, 1))
    if B >= 2:
        cap = min(cap, B // 2)
    tb = 1
    for cand in range(1, min(B, cap) + 1):
        if B % cand == 0:
            tb = cand
    return tb


def _pad_lanes(x, width):
    """Zero-pad the last (lane) dim of x to `width` (trace-time static)."""
    pad = width - x.shape[-1]
    if pad == 0:
        return x
    zeros = jnp.zeros(x.shape[:-1] + (pad,), x.dtype)
    return jnp.concatenate([x, zeros], axis=-1)


def attention_kernel(enc_ref, att2_ref, we_ref, be_ref, wf_ref, bf_ref,
                     awe_ref, alpha_ref):
    TB, N, E = enc_ref.shape          # encoder block: (TB, N, E)
    A = we_ref.shape[1]
    Ep = awe_ref.shape[-1]            # padded encoder dim (multiple of 128)
    Np = alpha_ref.shape[-1]          # padded pixel dim   (multiple of 128)

    enc = enc_ref[...]                                                   # (TB, N, E)

    # Encoder projection: one big MXU matmul over all TB*N pixel rows.
    att1 = jnp.dot(enc.reshape(TB * N, E), we_ref[...],
                   preferred_element_type=jnp.float32) + be_ref[...]     # (TB*N, A)

    # Decoder projection precomputed outside the kernel; broadcast over pixels + ReLU.
    h = jnp.maximum(att1.reshape(TB, N, A) + att2_ref[...], 0.0)         # (TB, N, A)

    # scores: VPU multiply by the wf row + lane reduction over A
    # (avoids a wasteful 1-output-column MXU matmul). Result is lane-major (TB, N).
    scores = jnp.sum(h * wf_ref[...], axis=-1) + bf_ref[...]             # (TB, N)

    # Softmax over the pixel axis, fully lane-dense.
    m = jnp.max(scores, axis=-1, keepdims=True)                          # (TB, 1)
    e = jnp.exp(scores - m)                                              # (TB, N)
    denom = jnp.sum(e, axis=-1, keepdims=True)                           # (TB, 1)
    alpha = e * pl.reciprocal(denom, approx=True)                        # (TB, N)

    # Attention-weighted encoding on the MXU: (TB, 1, N) @ (TB, N, E) -> (TB, 1, E).
    awe = jnp.einsum('bqn,bne->bqe', alpha[:, None, :], enc,
                     preferred_element_type=jnp.float32)                 # (TB, 1, E)

    # Lane-dense (128-padded) writebacks.
    awe_ref[...] = _pad_lanes(awe, Ep)                                   # (TB, 1, Ep)
    alpha_ref[...] = _pad_lanes(alpha, Np)[:, None, :]                   # (TB, 1, Np)


def attention_forward(encoder_out, decoder_hidden, params):
    """encoder_out: [B, N, E] f32, decoder_hidden: [B, D] f32 -> (awe [B, E], alpha [B, N])."""
    B, N, E = encoder_out.shape
    A = params["We"].shape[1]

    TB = _pick_batch_tile(B, N)
    G = B // TB
    Np = _round_up(N, 128)
    Ep = _round_up(E, 128)

    # Hoisted decoder projection: one (B, D) @ (D, A) GEMM in plain XLA.
    att2 = decoder_hidden @ params["Wd"] + params["bd"]                  # (B, A)
    att2_3 = att2.reshape(B, 1, A).astype(jnp.float32)

    be = params["be"].reshape(1, A)
    wf = params["wf"].reshape(1, A)
    bf = params["bf"].reshape(1, 1)

    awe_p, alpha_p = pl.pallas_call(
        attention_kernel,
        out_shape=(
            jax.ShapeDtypeStruct((B, 1, Ep), jnp.float32),
            jax.ShapeDtypeStruct((B, 1, Np), jnp.float32),
        ),
        grid_spec=pltpu.PrefetchScalarGridSpec(
            num_scalar_prefetch=0,
            grid=(G,),
            in_specs=[
                pl.BlockSpec((TB, N, E), lambda b: (b, 0, 0)),   # encoder_out tile
                pl.BlockSpec((TB, 1, A), lambda b: (b, 0, 0)),   # precomputed att2
                pl.BlockSpec((E, A), lambda b: (0, 0)),          # We
                pl.BlockSpec((1, A), lambda b: (0, 0)),          # be
                pl.BlockSpec((1, A), lambda b: (0, 0)),          # wf (row)
                pl.BlockSpec((1, 1), lambda b: (0, 0)),          # bf
            ],
            out_specs=[
                pl.BlockSpec((TB, 1, Ep), lambda b: (b, 0, 0)),  # awe (lane-padded)
                pl.BlockSpec((TB, 1, Np), lambda b: (b, 0, 0)),  # alpha (lane-padded)
            ],
        ),
        compiler_params=pltpu.CompilerParams(
            dimension_semantics=("parallel",),
            vmem_limit_bytes=32 * 1024 * 1024,
        ),
    )(encoder_out, att2_3, params["We"], be, wf, bf)

    return awe_p[:, 0, :E], alpha_p[:, 0, :N]


def init_params(key, encoder_dim, decoder_dim, attention_dim):
    """Deterministic init mirroring nn.Linear defaults (uniform +-1/sqrt(fan_in)).
    Weights stored transposed vs. PyTorch: We is [E, A] so att1 = x @ We."""
    k = jax.random.split(key, 6)

    def lin(kw, kb, fan_in, fan_out):
        bound = 1.0 / jnp.sqrt(fan_in)
        w = jax.random.uniform(kw, (fan_in, fan_out), jnp.float32, -bound, bound)
        b = jax.random.uniform(kb, (fan_out,), jnp.float32, -bound, bound)
        return w, b

    We, be = lin(k[0], k[1], encoder_dim, attention_dim)
    Wd, bd = lin(k[2], k[3], decoder_dim, attention_dim)
    wf, bf = lin(k[4], k[5], attention_dim, 1)
    return {"We": We, "be": be, "Wd": Wd, "bd": bd, "wf": wf.reshape(-1), "bf": bf}


def attention_ref(encoder_out, decoder_hidden, p):
    """Pure-JAX reference matching the PyTorch forward exactly."""
    att1 = encoder_out @ p["We"] + p["be"]                   # (B, N, A)
    att2 = decoder_hidden @ p["Wd"] + p["bd"]                # (B, A)
    h = jnp.maximum(att1 + att2[:, None, :], 0.0)            # (B, N, A)
    att = (h @ p["wf"].reshape(-1, 1) + p["bf"])[..., 0]     # (B, N)
    alpha = jax.nn.softmax(att, axis=1)                      # (B, N)
    awe = jnp.sum(encoder_out * alpha[..., None], axis=1)    # (B, E)
    return awe, alpha


if __name__ == "__main__":
    # batch, num_pixels, encoder/decoder/attention dims (small demo shapes)
    B, N, E, D, A = 4, 16, 32, 32, 32

    key = jax.random.PRNGKey(0)
    kx, kh, kp = jax.random.split(key, 3)
    encoder_out = jax.random.normal(kx, (B, N, E), jnp.float32)
    decoder_hidden = jax.random.normal(kh, (B, D), jnp.float32)
    params = init_params(kp, E, D, A)

    awe, alpha = attention_forward(encoder_out, decoder_hidden, params)
    jax.block_until_ready((awe, alpha))

    awe_r, alpha_r = attention_ref(encoder_out, decoder_hidden, params)
    # Tolerance accounts for the approximate (EUP) reciprocal in the softmax denominator.
    assert jnp.allclose(awe, awe_r, atol=2e-3, rtol=2e-3)
    assert jnp.allclose(alpha, alpha_r, atol=2e-3, rtol=2e-3)

    print("KERNEL_OK")
</pallas_src>

<mosaic_0001>
module attributes {stable_mosaic.version = 11 : i64} {
  func.func @attention_kernel(%arg0: i32, %arg1: memref<2x16x32xf32, #tpu.memory_space<vmem>>, %arg2: memref<2x1x32xf32, #tpu.memory_space<vmem>>, %arg3: memref<32x32xf32, #tpu.memory_space<vmem>>, %arg4: memref<1x32xf32, #tpu.memory_space<vmem>>, %arg5: memref<1x32xf32, #tpu.memory_space<vmem>>, %arg6: memref<1x1xf32, #tpu.memory_space<vmem>>, %arg7: memref<2x1x128xf32, #tpu.memory_space<vmem>>, %arg8: memref<2x1x128xf32, #tpu.memory_space<vmem>>) attributes {dimension_semantics = [#tpu.dimension_semantics<parallel>], iteration_bounds = array<i64: 2>, scalar_prefetch = 0 : i64, scratch_operands = 0 : i64, tpu.core_type = #tpu.core_type<tc>, window_params = [{transform_indices = @transform_0, window_bounds = array<i64: 2, 16, 32>}, {transform_indices = @transform_1, window_bounds = array<i64: 2, 1, 32>}, {pipeline_mode = #tpu.pipeline_mode<synchronous>, transform_indices = @transform_2, window_bounds = array<i64: 32, 32>}, {pipeline_mode = #tpu.pipeline_mode<synchronous>, transform_indices = @transform_3, window_bounds = array<i64: 1, 32>}, {pipeline_mode = #tpu.pipeline_mode<synchronous>, transform_indices = @transform_4, window_bounds = array<i64: 1, 32>}, {pipeline_mode = #tpu.pipeline_mode<synchronous>, transform_indices = @transform_5, window_bounds = array<i64: 1, 1>}, {transform_indices = @transform_6, window_bounds = array<i64: 2, 1, 128>}, {transform_indices = @transform_7, window_bounds = array<i64: 2, 1, 128>}]} {
    %c0 = arith.constant 0 : index
    %c0_0 = arith.constant 0 : index
    %c0_1 = arith.constant 0 : index
    %0 = vector.load %arg1[%c0, %c0_0, %c0_1] : memref<2x16x32xf32, #tpu.memory_space<vmem>>, vector<2x16x32xf32>
    %1 = vector.shape_cast %0 : vector<2x16x32xf32> to vector<32x32xf32>
    %c0_2 = arith.constant 0 : index
    %c0_3 = arith.constant 0 : index
    %2 = vector.load %arg3[%c0_2, %c0_3] : memref<32x32xf32, #tpu.memory_space<vmem>>, vector<32x32xf32>
    %cst = arith.constant dense<0.000000e+00> : vector<32x32xf32>
    %3 = tpu.matmul %1, %2, %cst {dimension_numbers = #tpu.dot_dimension_numbers<[1], [0], [0], [1], [0, 0, 1, 1], [], []>} : vector<32x32xf32>, vector<32x32xf32>, vector<32x32xf32> -> vector<32x32xf32>
    %c0_4 = arith.constant 0 : index
    %c0_5 = arith.constant 0 : index
    %4 = vector.load %arg4[%c0_4, %c0_5] : memref<1x32xf32, #tpu.memory_space<vmem>>, vector<1x32xf32>
    %5 = vector.broadcast %4 : vector<1x32xf32> to vector<32x32xf32>
    %6 = arith.addf %3, %5 : vector<32x32xf32>
    %7 = vector.shape_cast %6 : vector<32x32xf32> to vector<2x16x32xf32>
    %c0_6 = arith.constant 0 : index
    %c0_7 = arith.constant 0 : index
    %c0_8 = arith.constant 0 : index
    %8 = vector.load %arg2[%c0_6, %c0_7, %c0_8] : memref<2x1x32xf32, #tpu.memory_space<vmem>>, vector<2x1x32xf32>
    %9 = vector.broadcast %8 : vector<2x1x32xf32> to vector<2x16x32xf32>
    %10 = arith.addf %7, %9 : vector<2x16x32xf32>
    %cst_9 = arith.constant 0.000000e+00 : f32
    %11 = vector.broadcast %cst_9 : f32 to vector<2x16x32xf32>
    %12 = arith.maximumf %10, %11 : vector<2x16x32xf32>
    %c0_10 = arith.constant 0 : index
    %c0_11 = arith.constant 0 : index
    %13 = vector.load %arg5[%c0_10, %c0_11] : memref<1x32xf32, #tpu.memory_space<vmem>>, vector<1x32xf32>
    %14 = vector.shape_cast %13 : vector<1x32xf32> to vector<1x1x32xf32>
    %15 = vector.broadcast %14 : vector<1x1x32xf32> to vector<2x16x32xf32>
    %16 = arith.mulf %12, %15 : vector<2x16x32xf32>
    %cst_12 = arith.constant dense<0.000000e+00> : vector<2x16xf32>
    %17 = vector.multi_reduction <add>, %16, %cst_12 [2] : vector<2x16x32xf32> to vector<2x16xf32>
    %c0_13 = arith.constant 0 : index
    %c0_14 = arith.constant 0 : index
    %18 = vector.load %arg6[%c0_13, %c0_14] : memref<1x1xf32, #tpu.memory_space<vmem>>, vector<1x1xf32>
    %19 = vector.broadcast %18 : vector<1x1xf32> to vector<2x16xf32>
    %20 = arith.addf %17, %19 : vector<2x16xf32>
    %cst_15 = arith.constant dense<0xFF800000> : vector<2xf32>
    %21 = vector.multi_reduction <maximumf>, %20, %cst_15 [1] : vector<2x16xf32> to vector<2xf32>
    %22 = vector.shape_cast %21 : vector<2xf32> to vector<2x1xf32>
    %23 = vector.broadcast %22 : vector<2x1xf32> to vector<2x16xf32>
    %24 = arith.subf %20, %23 : vector<2x16xf32>
    %25 = math.exp %24 : vector<2x16xf32>
    %cst_16 = arith.constant dense<0.000000e+00> : vector<2xf32>
    %26 = vector.multi_reduction <add>, %25, %cst_16 [1] : vector<2x16xf32> to vector<2xf32>
    %27 = vector.shape_cast %26 : vector<2xf32> to vector<2x1xf32>
    %28 = tpu.reciprocal %27 {approx = true} : vector<2x1xf32> -> vector<2x1xf32>
    %29 = vector.broadcast %28 : vector<2x1xf32> to vector<2x16xf32>
    %30 = arith.mulf %25, %29 : vector<2x16xf32>
    %31 = vector.shape_cast %30 : vector<2x16xf32> to vector<2x1x16xf32>
    "tpu.trace_start"() <{level = 10 : i32, message = "bqn,bne->bqe"}> : () -> ()
    %cst_17 = arith.constant dense<0.000000e+00> : vector<2x1x32xf32>
    %32 = tpu.matmul %31, %0, %cst_17 {dimension_numbers = #tpu.dot_dimension_numbers<[2], [1], [1], [2], [0, 0, 0, 1, 1, 2], [0], [0]>} : vector<2x1x16xf32>, vector<2x16x32xf32>, vector<2x1x32xf32> -> vector<2x1x32xf32>
    %cst_18 = arith.constant 0.000000e+00 : f32
    "tpu.trace_stop"() : () -> ()
    %33 = vector.broadcast %cst_18 : f32 to vector<2x1x96xf32>
    %34 = tpu.concatenate %32, %33 in 2 : vector<2x1x32xf32>, vector<2x1x96xf32> -> vector<2x1x128xf32>
    %c0_19 = arith.constant 0 : index
    %c0_20 = arith.constant 0 : index
    %c0_21 = arith.constant 0 : index
    %35 = vector.load %arg7[%c0_19, %c0_20, %c0_21] : memref<2x1x128xf32, #tpu.memory_space<vmem>>, vector<2x1x128xf32>
    tpu.vector_store %arg7[%c0_19, %c0_20, %c0_21], %34 {strides = array<i32>} : memref<2x1x128xf32, #tpu.memory_space<vmem>>, vector<2x1x128xf32>,
    %cst_22 = arith.constant 0.000000e+00 : f32
    %36 = vector.broadcast %cst_22 : f32 to vector<2x112xf32>
    %37 = tpu.concatenate %30, %36 in 1 : vector<2x16xf32>, vector<2x112xf32> -> vector<2x128xf32>
    %38 = vector.shape_cast %37 : vector<2x128xf32> to vector<2x1x128xf32>
    %c0_23 = arith.constant 0 : index
    %c0_24 = arith.constant 0 : index
    %c0_25 = arith.constant 0 : index
    %39 = vector.load %arg8[%c0_23, %c0_24, %c0_25] : memref<2x1x128xf32, #tpu.memory_space<vmem>>, vector<2x1x128xf32>
    tpu.vector_store %arg8[%c0_23, %c0_24, %c0_25], %38 {strides = array<i32>} : memref<2x1x128xf32, #tpu.memory_space<vmem>>, vector<2x1x128xf32>,
    return
  }
  func.func @transform_0(%arg0: i32) -> (i32, i32, i32) {
    %c0_i32 = arith.constant 0 : i32
    %c0_i32_0 = arith.constant 0 : i32
    %c0_i32_1 = arith.constant 0 : i32
    return %arg0, %c0_i32, %c0_i32_0 : i32, i32, i32
  }
  func.func @transform_1(%arg0: i32) -> (i32, i32, i32) {
    %c0_i32 = arith.constant 0 : i32
    %c0_i32_0 = arith.constant 0 : i32
    %c0_i32_1 = arith.constant 0 : i32
    return %arg0, %c0_i32, %c0_i32_0 : i32, i32, i32
  }
  func.func @transform_2(%arg0: i32) -> (i32, i32) {
    %c0_i32 = arith.constant 0 : i32
    %c0_i32_0 = arith.constant 0 : i32
    %c0_i32_1 = arith.constant 0 : i32
    return %c0_i32, %c0_i32_0 : i32, i32
  }
  func.func @transform_3(%arg0: i32) -> (i32, i32) {
    %c0_i32 = arith.constant 0 : i32
    %c0_i32_0 = arith.constant 0 : i32
    %c0_i32_1 = arith.constant 0 : i32
    return %c0_i32, %c0_i32_0 : i32, i32
  }
  func.func @transform_4(%arg0: i32) -> (i32, i32) {
    %c0_i32 = arith.constant 0 : i32
    %c0_i32_0 = arith.constant 0 : i32
    %c0_i32_1 = arith.constant 0 : i32
    return %c0_i32, %c0_i32_0 : i32, i32
  }
  func.func @transform_5(%arg0: i32) -> (i32, i32) {
    %c0_i32 = arith.constant 0 : i32
    %c0_i32_0 = arith.constant 0 : i32
    %c0_i32_1 = arith.constant 0 : i32
    return %c0_i32, %c0_i32_0 : i32, i32
  }
  func.func @transform_6(%arg0: i32) -> (i32, i32, i32) {
    %c0_i32 = arith.constant 0 : i32
    %c0_i32_0 = arith.constant 0 : i32
    %c0_i32_1 = arith.constant 0 : i32
    return %arg0, %c0_i32, %c0_i32_0 : i32, i32, i32
  }
  func.func @transform_7(%arg0: i32) -> (i32, i32, i32) {
    %c0_i32 = arith.constant 0 : i32
    %c0_i32_0 = arith.constant 0 : i32
    %c0_i32_1 = arith.constant 0 : i32
    return %arg0, %c0_i32, %c0_i32_0 : i32, i32, i32
  }
}

</mosaic_0001>

<bundles_post_ra>
// kernel: tpu_custom_call.1
= control target key start
LH: loop header
LB: loop body
LE: loop exit
PB: predicated region body
PF: predicated region fallthrough
CT: control target
= control target key end

     0   :  { %s1808_s0 = inlined_call_operand.hbm [shape: f32[4,16,32], index: 0, kind: input, shape index: {}]   ;;  %s1809_s1 = inlined_call_operand.hbm [shape: f32[4,1,32], index: 1, kind: input, shape index: {}]   ;;  %s1810_s2 = inlined_call_operand.hbm [shape: f32[32,32], index: 2, kind: input, shape index: {}]   ;;  %s1811_s3 = inlined_call_operand.vmem [shape: f32[1,32], index: 3, kind: input, shape index: {}]   ;;  %s1812_s4 = inlined_call_operand.vmem [shape: f32[1,32], index: 4, kind: input, shape index: {}]   ;;  %s1813_s5 = inlined_call_operand.<no memory space> [shape: f32[1,1], index: 5, kind: input, shape index: {}]   ;;  %s1814_s6 = inlined_call_operand.hbm [shape: f32[4,1,128], index: 6, kind: output, shape index: {0}]   ;;  %s1815_s7 = inlined_call_operand.hbm [shape: f32[4,1,128], index: 7, kind: output, shape index: {1}]  }
   0x1   :  { %1821 = sst [smem:[#allocation19_spill]] %s1808_s0  ;;  %v13_v0 = vstv %s1813_s5 }
   0x2   :  { %1822 = sst [smem:[#allocation20_spill]] %s1810_s2  ;;  %14 = vst [vmem:[#allocation2] sm:$0x1] %v13_v0 }
   0x3   :  { %15 = vsyncpa [#allocation4], 0 }
   0x4   :  { %17 = vsyncpa [#allocation4 + $0x1], 0 }
   0x5   :  { %18 = vsyncpa [#allocation7], 0 }
   0x6   :  { %20 = vsyncpa [#allocation7 + $0x1], 0 }
   0x7   :  { %21 = vsyncpa [#allocation5], 0 }
   0x8   :  { %23 = vsyncpa [#allocation5 + $0x1], 0 }
   0x9   :  { %24 = vsyncpa [#allocation11], 0 }
   0xa   :  { %26 = vsyncpa [#allocation11 + $0x1], 0  ;;  %s1455_s26 = smov 0   ;;  %s1457_s27 = smov 0  }
   0xb   :  { %s1459_s28 = smov 0   ;;  %s1461_s29 = smov 0  }
   0xc LB: > { %1823 = sst [smem:[#allocation17_spill]] %s1391_s28  ;;  %s1476_s5 = sadd.s32 4294967295, %s1395_s29   ;;  %s1395_s29 = sphi %s1461_s29, %s1847_s29   ;;  %s1391_s28 = sphi %s1459_s28, %s1844_s28   ;;  %s1387_s27 = sphi %s1457_s27, %s1846_s27   ;;  %s1383_s26 = sphi %s1455_s26, %s1845_s26  }
   0xd   : > { %s1037_s30 = sadd.s32 4294967294, %s1395_s29   ;;  %p52_p0 = scmp.ne.s32.totalorder %s1387_s27, %s1383_s26 }
   0xe   : > { %p1817_p1 = scmp.eq.s32.totalorder %s1476_s5, 0  ;;  %p192_p3 = scmp.eq.s32.totalorder %s1037_s30, 1 }
   0xf   : > { %p1038_p5 = scmp.ge.s32.totalorder %s1395_s29, 1  ;;  %p225_p7 = scmp.lt.s32.totalorder %s1395_s29, 3 }
  0x10   : > { %p1485_p4 = por %p1817_p1, %p52_p0  ;;  %p1490_p6 = por %p192_p3, %p52_p0 }
  0x11   : > { %p1495_p8 = pnand %p1038_p5, %p225_p7  ;;  %s1397_s11 = smov [#allocation8]  }
  0x12   : > { %s1824_s8 = scalar_select %p1485_p4, 1, 0 }
  0x13   : > { %s1825_s9 = scalar_select %p1490_p6, 1, 0 }
  0x14   : > { %s237_s12 = sshll.u32 %s1397_s11, 4  ;;  %p1134_p9 = pneg %p1495_p8  ;;  %s238_s12 = int_to_ptr.vmem [resolvable:$true] %s237_s12 }
  0x15   : > { %s1509_s14 = sadd.s32 1, %s1395_s29   ;;  %s39_s15 = sadd.s32 1, %s1391_s28 }
  0x16   : > { %p1504_p11 = pnand %p1134_p9, %p1817_p1  ;;  %s36_s16 = ssub.s32 %s1395_s29, %s1509_s14 }
  0x17   : > { %s1222_s17 = scalar_lea.vmem %s238_s12, 512  ;;  %p1230_p5 = scmp.lt.s32.totalorder %s238_s12, %s238_s12 }
  0x18   : > { %p1213_p12 = pneg %p1504_p11  ;;  %p1223_p13 = scmp.ne.s32.totalorder %s238_s12, %s1222_s17 }
  0x19   : > { %p1231_p7 = scmp.lt.s32.totalorder %s1222_s17, %s1222_s17 }
  0x1a   : > { %p1225_p0 = pnand %p1223_p13, %p1213_p12 }
  0x1b   : > { %p1232_p10 = por %p1231_p7, %p1230_p5 }
  0x1c   : > { %p1226_p3 = pneg %p1225_p0 }
  0x1e   : > { %p1233_p2 = pnand %p1232_p10, %p1226_p3 }
  0x20   : > { %1236 = shalt.err (!%p1233_p2)
}
  0x21   : > { %s1816_s18 = smov 128   ;;  %s1399_s19 = smov 8  }
  0x22   : > { %s1828_s2 = sld [smem:[#allocation20_spill]]  ;;  %p37_p2 = scmp.eq.s32.totalorder %s36_s16, 0 }
  0x23   : > { %p46_p9 = scmp.ne.s32.totalorder %s1391_s28, %s1387_s27  ;;  %p47_p10 = scmp.eq.s32.totalorder %s1395_s29, 0 }
  0x24   : > { %p1153_p12 = scmp.lt.s32.totalorder %s1395_s29, 2  ;;  %p1830_p0 = scmp.eq.s32.totalorder %s1476_s5, 1 }
  0x25   : > { %s1529_s22 = scalar_select %p37_p2, %s1391_s28, %s39_s15  }
  0x26   : > { %p48_p13 = por %p47_p10, %p46_p9  ;;  %p1533_p3 = por %p1830_p0, %p46_p9 }
  0x27   : > { %1829 = sst [smem:[#allocation18_spill]] %s1529_s22  ;;  %s1538_s24 = sand.u32 1, %s1391_s28  }
  0x28   : > { %1137 = dma.hbm_to_vmem [thread:$0]  (!%p1504_p11), %s1828_s2, 512, %s238_s12, [#allocation7], %s1816_s18, %s1816_s18, %s1399_s19  }
  0x29   : > { %s1831_s23 = scalar_select %p1533_p3, 1, 0 }
  0x2a   : > { %s1076_s25 = sshll.u32 %s1395_s29, 9  ;;  %s1041_s30 = sshll.u32 %s1538_s24, 5 }
  0x2b   : > { %s1832_s0 = sld [smem:[#allocation19_spill]]  ;;  %s264_s15 = scalar_lea.vmem [#allocation3], %s1041_s30 }
  0x2c   : > { %s272_s16 = sshll.u32 %s264_s15, 4  ;;  %p1547_p11 = pnand %p1153_p12, %p48_p13  ;;  %s1551_s16 = int_to_ptr.vmem [resolvable:$true] %s272_s16 }
  0x2e   : > { %p1239_p7 = pneg %p1547_p11 }
  0x31   : > { %s1545_s13 = scalar_lea.hbm %s1832_s0, %s1076_s25  ;;  %s1242_s11 = scalar_lea.hbm %s1832_s0, 1024 }
  0x32   : > { %s1237_s18 = scalar_lea.hbm %s1545_s13, 512  ;;  %p1243_p10 = scmp.lt.s32.totalorder %s1545_s13, %s1832_s0 }
  0x33   : > { %p1238_p5 = scmp.ne.s32.totalorder %s1545_s13, %s1237_s18  ;;  %p1244_p12 = scmp.lt.s32.totalorder %s1242_s11, %s1237_s18 }
  0x35   : > { %p1240_p2 = pnand %p1239_p7, %p1238_p5  ;;  %p1245_p13 = por %p1244_p12, %p1243_p10 }
  0x37   : > { %p1241_p9 = pneg %p1240_p2 }
  0x39   : > { %p1246_p0 = pnand %p1245_p13, %p1241_p9 }
  0x3b   : > { %1249 = shalt.err (!%p1246_p0)
}
  0x3c   : > { %s1250_s20 = scalar_lea.vmem %s1551_s16, 512  ;;  %s1400_s25 = smov [#allocation3]  }
  0x3d   : > { %p1251_p1 = scmp.ne.s32.totalorder %s1551_s16, %s1250_s20  ;;  %s1255_s30 = sshll.u32 %s1400_s25, 4  ;;  %s1256_s30 = int_to_ptr.vmem [resolvable:$false] %s1255_s30 }
  0x3e   : > { %s1257_s21 = scalar_lea.vmem %s1256_s30, 1024  ;;  %p1258_p6 = scmp.lt.s32.totalorder %s1551_s16, %s1256_s30 }
  0x3f   : > { %p1253_p5 = pnand %p1251_p1, %p1239_p7  ;;  %p1259_p3 = scmp.lt.s32.totalorder %s1257_s21, %s1250_s20 }
  0x41   : > { %p1254_p2 = pneg %p1253_p5  ;;  %p1260_p4 = por %p1259_p3, %p1258_p6 }
  0x43   : > { %p1261_p10 = pnand %p1260_p4, %p1254_p2 }
  0x45   : > { %1264 = shalt.err (!%p1261_p10)
}
  0x46   : > { %s1834_s18 = smov 128   ;;  %s1835_s11 = scalar_lea.sflag [#allocation4], %s1538_s24 }
  0x47   : > { %1141 = dma.hbm_to_vmem [thread:$0]  (!%p1547_p11), %s1545_s13, 512, %s1551_s16, %s1835_s11, %s1834_s18, %s1834_s18, %s1399_s19  }
  0x48   : > { %s1045_s12 = sshll.u32 %s1538_s24, 1  ;;  %s1077_s15 = sshll.u32 %s1395_s29, 5 }
  0x49   : > { %s1589_s25 = scalar_lea.hbm %s1809_s1, %s1077_s15  ;;  %s286_s30 = scalar_lea.vmem [#allocation6], %s1045_s12 }
  0x4a   : > { %s293_s0 = sshll.u32 %s286_s30, 4  ;;  %s1836_s2 = sand.u32 1, %s1395_s29   ;;  %s1591_s0 = int_to_ptr.vmem [resolvable:$true] %s293_s0 }
  0x4b   : > { %s1595_s22 = scalar_lea.sflag [#allocation7], %s1836_s2  ;;  %s1265_s28 = scalar_lea.hbm %s1589_s25, 32 }
  0x4c   : > { %p1266_p1 = scmp.ne.s32.totalorder %s1589_s25, %s1265_s28  ;;  %s1270_s13 = scalar_lea.hbm %s1809_s1, 64 }
  0x4d   : > { %p1271_p3 = scmp.lt.s32.totalorder %s1589_s25, %s1809_s1  ;;  %p1272_p9 = scmp.lt.s32.totalorder %s1270_s13, %s1265_s28 }
  0x4e   : > { %p1268_p4 = pnand %p1266_p1, %p1239_p7 }
  0x4f   : > { %p1273_p12 = por %p1272_p9, %p1271_p3 }
  0x50   : > { %p1269_p6 = pneg %p1268_p4 }
  0x52   : > { %p1274_p13 = pnand %p1273_p12, %p1269_p6 }
  0x54   : > { %1277 = shalt.err (!%p1274_p13)
}
  0x55   : > { %s1278_s2 = scalar_lea.vmem %s1591_s0, 32  ;;  %s1401_s11 = smov [#allocation6]  }
  0x56   : > { %p1279_p0 = scmp.ne.s32.totalorder %s1591_s0, %s1278_s2  ;;  %s1283_s12 = sshll.u32 %s1401_s11, 4  ;;  %s1284_s12 = int_to_ptr.vmem [resolvable:$false] %s1283_s12 }
  0x57   : > { %s1285_s15 = scalar_lea.vmem %s1284_s12, 64  ;;  %p1286_p10 = scmp.lt.s32.totalorder %s1591_s0, %s1284_s12 }
  0x58   : > { %p1281_p5 = pnand %p1279_p0, %p1239_p7  ;;  %p1287_p1 = scmp.lt.s32.totalorder %s1285_s15, %s1278_s2 }
  0x5a   : > { %p1282_p2 = pneg %p1281_p5  ;;  %p1288_p4 = por %p1287_p1, %p1286_p10 }
  0x5c   : > { %p1289_p3 = pnand %p1288_p4, %p1282_p2 }
  0x5e   : > { %1292 = shalt.err (!%p1289_p3)
}
  0x5f   : > { %s1402_s28 = smov 16   ;;  %s1403_s20 = smov 1  }
  0x60   : > { %1144 = dma.hbm_to_vmem [thread:$0]  (!%p1547_p11), %s1589_s25, 32, %s1591_s0, %s1595_s22, %s1402_s28, %s1402_s28, %s1403_s20  }
  0x61   : > { %305 = sbr.rel (%p1495_p8) target bundleno = 1278 (0x4fe), region = 44  ;;  %s1623_s21 = sand.u32 (!%p1495_p8), 1, %s1387_s27  }
  0x62   : > { %s1049_s30 = sshll.u32 (!%p1495_p8), %s1623_s21, 5  ;;  %s308_s19 = scalar_lea.sflag (!%p1495_p8), [#allocation4], %s1623_s21 }
  0x63   : > { %s311_s24 = scalar_lea.vmem (!%p1495_p8), [#allocation3], %s1049_s30  ;;  %p1837_p7 = scmp.ne.s32.totalorder (!%p1495_p8), %s1824_s8, 0 }
  0x66   : > { %1362 = dma.done.wait (%p1837_p7), %s308_s19, 512  }
  0x67   : > { %1364 = vsyncadd (%p1837_p7), %s308_s19, 4294966784  ;;  %s316_s0 = sand.u32 1, %s1476_s5   ;;  %s1633_s10 = sshll.u32 %s1623_s21, 1 }
  0x68   : > { %s317_s22 = scalar_lea.sflag [#allocation7], %s316_s0  ;;  %s320_s17 = scalar_lea.vmem [#allocation6], %s1633_s10 }
  0x69   : > { %1366 = dma.done.wait (%p1837_p7), %s317_s22, 32  }
  0x6a   : > { %1368 = vsyncadd (%p1837_p7), %s317_s22, 4294967264  ;;  %p1838_p8 = scmp.eq.s32.totalorder %s1476_s5, 0 }
  0x6c   : > { %1370 = dma.done.wait (%p1838_p8), [#allocation7], 512   ;;  %p1839_p11 = pmov %p1838_p8 }
  0x6d   : > { %vm384_vm0 = vcmask 261120   ;;  %v376_v1 = vld [vmem:[#allocation8 + $0x18] sm:$0xff]  ;;  %v375_v2 = vld [vmem:[#allocation8 + $0x10] sm:$0xff]  ;;  %v374_v4 = vld [vmem:[#allocation8 + $0x8] sm:$0xff]  ;;  %v1404_v9 = vmov 0   ;;  %v545_v39 = vlaneseq  ;;  %vm556_vm1 = vcmask 130112  }
  0x6e   : > { %1372 = vsyncadd (%p1839_p11), [#allocation7], 4294966784  ;;  %1094 = vmatprep.subr.mxu0 %v376_v1  ;;  %v1644_v3 = vld [vmem:[%s311_s24] sm:$0xff]  ;;  %v1648_v6 = vld [vmem:[%s311_s24 + $0x8] sm:$0xff]  ;;  %1199 = vset.pattern.permute.xlu0 %v1404_v9  ;;  %vm567_vm2 = vcmask 1041409   ;;  %vm570_vm3 = vcmask 123904  }
  0x6f   : > { %1095 = vmatpush3.msra.mxu0 %v376_v1  ;;  %1102 = vmatprep.mubr.msk.f32.mxu0 %vm384_vm0, %v1644_v3  ;;  %v373_v5 = vld [vmem:[#allocation8] sm:$0xff]  ;;  %v1650_v7 = vld [vmem:[%s311_s24 + $0x10] sm:$0xff]  ;;  %v1656_v8 = vld [vmem:[%s311_s24 + $0x18] sm:$0xff]  ;;  %v546_v41 = vand.u32 127, %v545_v39  ;;  %v1674_v43 = vshrl.u32 %v545_v39, 7  ;;  %vm1406_vm4 = vmmov 0  }
  0x70   : > { %1096 = vmatprep.subr.mxu0 %v375_v2  ;;  %1200 = vset.pattern.permute.xlu1 %v1404_v9  ;;  %v1054_v10 = vld [vmem:[%s1811_s3] ss:$0 sm:$0xff]  ;;  %v1059_v12 = vld [vmem:[%s320_s17] ss:$0 sm:$0xff]  ;;  %v1060_v18 = vld [vmem:[%s320_s17 + $0x1] ss:$0 sm:$0xff] }
  0x71   : > { %1097 = vmatpush3.msra.mxu0 %v375_v2  ;;  %v1061_v19 = vld [vmem:[%s1812_s4] ss:$0 sm:$0xff]  ;;  %v551_v44 = vadd.s32 4294967288, %v546_v41  ;;  %v1677_v46 = vsub.s32 %v546_v41, %v1674_v43  ;;  %v577_v62 = vsub.s32 0, %v1674_v43  ;;  %v581_v63 = vsub.s32 1, %v1674_v43  ;;  %s364_s18 = scalar_lea.vmem [#allocation10], %s1633_s10 }
  0x72   : > { %1098 = vmatprep.subr.mxu0 %v374_v4  ;;  %v1062_v38 = vld [vmem:[#allocation2] ss:$0 sm:$0xff]  ;;  %vm669_vm5 = vcmask 130048   ;;  %s1078_s2 = sshll.u32 %s1476_s5, 5  ;;  %s900_s28 = sshll.u32 %s364_s18, 4  ;;  %s1726_s28 = int_to_ptr.vmem [resolvable:$true] %s900_s28 }
  0x73   : > { %1099 = vmatpush3.msra.mxu0 %v374_v4  ;;  %v1680_v47 = vsub.s32 %v551_v44, %v1674_v43  ;;  %v1407_v44 = vmov 1966171168   ;;  %s1724_s15 = scalar_lea.hbm %s1815_s7, %s1078_s2  ;;  %s871_s20 = scalar_lea.sflag [#allocation11], %s1623_s21 }
  0x74   : > { %1100 = vmatprep.subr.mxu0 %v373_v5  ;;  %s1293_s30 = scalar_lea.vmem %s1726_s28, 32  ;;  %p1840_p9 = scmp.ne.s32.totalorder %s1831_s23, 0 }
  0x75   : > { %1101 = vmatpush3.msra.mxu0 %v373_v5  ;;  %p1294_p6 = scmp.ne.s32.totalorder %s1726_s28, %s1293_s30  ;;  %s1408_s19 = smov [#allocation10]  }
  0x76   : > { %1103 = vmatmul.mubr.msk.f32.vlgmr.msra.gmra.mxu0 %vm384_vm0, %v1648_v6  ;;  %s1297_s24 = sshll.u32 %s1408_s19, 4  ;;  %s1298_s24 = int_to_ptr.vmem [resolvable:$false] %s1297_s24 }
  0x77   : > { %1105 = vmatprep.mubr.msk.f32.mxu0 %vm384_vm0, %v1650_v7  ;;  %p1295_p12 = pnand %p1294_p6, %p1840_p9  ;;  %s1299_s0 = scalar_lea.vmem %s1298_s24, 64 }
  0x78   : > { %p1300_p0 = scmp.lt.s32.totalorder %s1726_s28, %s1298_s24  ;;  %p1301_p5 = scmp.lt.s32.totalorder %s1299_s0, %s1293_s30 }
  0x79   : > { %p1296_p13 = pneg %p1295_p12 }
  0x7a   : > { %1106 = vmatmul.mubr.msk.f32.gmra.mxu0 %vm384_vm0, %v1656_v8  ;;  %p1302_p2 = por %p1301_p5, %p1300_p0 }
  0x7c   : > { %p1303_p10 = pnand %p1302_p2, %p1296_p13 }
 0x136   : > { %v1104_v11 = vpop.f32.mrf.mxu0 }
 0x137   : > { %v469_v13 = vadd.f32 %v1104_v11, %v1054_v10 }
 0x138   : > { %v463_v14 = vpop.f32.mrf.mxu0 }
 0x139   : > { %v497_v15 = vadd.f32 %v1059_v12, %v469_v13  ;;  %v464_v16 = vadd.f32 %v1054_v10, %v463_v14 }
 0x13a   : > { %v1107_v17 = vpop.f32.mrf.mxu0 }
 0x13b   : > { %v501_v20 = vmax.f32 %v497_v15, 0.0  ;;  %v496_v21 = vadd.f32 %v1059_v12, %v464_v16  ;;  %v479_v22 = vadd.f32 %v1107_v17, %v1054_v10 }
 0x13c   : > { %v473_v23 = vpop.f32.mrf.mxu0 }
 0x13d   : > { %v500_v24 = vmax.f32 %v496_v21, 0.0  ;;  %v499_v25 = vadd.f32 %v1060_v18, %v479_v22  ;;  %v474_v26 = vadd.f32 %v1054_v10, %v473_v23  ;;  %v512_v27 = vmul.f32 %v1061_v19, %v501_v20 }
 0x13f   : > { %v498_v28 = vadd.f32 %v1060_v18, %v474_v26  ;;  %v518_v29 = vsel %vm384_vm0, %v512_v27, 0.0  ;;  %v511_v30 = vmul.f32 %v1061_v19, %v500_v24  ;;  %v503_v31 = vmax.f32 %v499_v25, 0.0 }
 0x140   : > { %519 = vadd.xlane.f32.xlu0 %v518_v29 }
 0x141   : > { %v502_v32 = vmax.f32 %v498_v28, 0.0  ;;  %v515_v33 = vsel %vm384_vm0, %v511_v30, 0.0  ;;  %v514_v36 = vmul.f32 %v1061_v19, %v503_v31 }
 0x143   : > { %v513_v34 = vmul.f32 %v1061_v19, %v502_v32  ;;  %v524_v37 = vsel %vm384_vm0, %v514_v36, 0.0 }
 0x144   : > { %516 = vadd.xlane.f32.xlu0 %v515_v33 }
 0x145   : > { %v521_v35 = vsel %vm384_vm0, %v513_v34, 0.0  ;;  %v1405_v34 = vmov 0.0  }
 0x146   : > { %522 = vadd.xlane.f32.xlu1 %v521_v35  ;;  %1108 = vmatprep.subr.mxu1 %v1405_v34 }
 0x147   : > { %1109 = vmatpush3.msra.mxu1 %v1648_v6  ;;  %1112 = vmatprep.mubr.msk.f32.mxu1 %vm1406_vm4, %v1405_v34 }
 0x148   : > { %1110 = vmatprep.subr.mxu1 %v1405_v34 }
 0x149   : > { %1111 = vmatpush3.msra.mxu1 %v1644_v3  ;;  %v840_v3 = vunpack.c.l.s4 %v1407_v44 }
 0x14a   : > { %525 = vadd.xlane.f32.xlu1 %v524_v37  ;;  %1115 = vmatprep.subr.mxu1 %v1405_v34 }
 0x15a   : > { %534 = vperm.xlu0 %1199, %v1062_v38  }
 0x1c9   : > { %v520_v40 = vpop.xlane.xlu0 %519 }
 0x1cd   : > { %v517_v45 = vpop.xlane.xlu0 %516 }
 0x1cf   : > { %v523_v42 = vpop.xlane.xlu1 %522 }
 0x1d3   : > { %v526_v48 = vpop.xlane.xlu1 %525 }
 0x1d5   : > { %v535_v49 = vpop.permute.xlu0 %534 }
 0x1d6   : > { %v537_v50 = vadd.f32 %v535_v49, %v517_v45  ;;  %v538_v51 = vadd.f32 %v535_v49, %v520_v40  ;;  %v539_v52 = vadd.f32 %v535_v49, %v523_v42  ;;  %v540_v53 = vadd.f32 %v535_v49, %v526_v48 }
 0x1d7   : > { %v841_v49 = vunpack.c.0.s8 %v840_v3 }
 0x1d8   : > { %v550_v54 = vrot.slane %v537_v50, %v1677_v46  ;;  %v555_v55 = vrot.slane %v538_v51, %v1680_v47  ;;  %v561_v56 = vrot.slane %v539_v52, %v1677_v46  ;;  %v565_v57 = vrot.slane %v540_v53, %v1680_v47 }
 0x1da   : > { %v557_v58 = vsel %vm556_vm1, %v555_v55, %v550_v54  ;;  %v566_v59 = vsel %vm556_vm1, %v565_v57, %v561_v56 }
 0x1db   : > { %v568_v60 = vsel %vm567_vm2, %v566_v59, %v557_v58 }
 0x1dc   : > { %v571_v61 = vsel %vm570_vm3, %v568_v60, -inf }
 0x1dd   : > { %572 = vmax.xlane.f32.xlu1 %v571_v61 }
 0x266   : > { %v573_v0 = vpop.xlane.xlu1 %572 }
 0x267   : > { %v578_v1 = vrot.slane %v573_v0, %v577_v62  ;;  %v582_v2 = vrot.slane %v573_v0, %v581_v63 }
 0x269   : > { %v585_v4 = vsub.f32 %v537_v50, %v578_v1  ;;  %v586_v5 = vsub.f32 %v538_v51, %v578_v1  ;;  %v587_v10 = vsub.f32 %v539_v52, %v582_v2  ;;  %v588_v12 = vsub.f32 %v540_v53, %v582_v2 }
 0x26a   : > { %v844_v53 = vsub.s32 %v841_v49, %v1674_v43 }
 0x26b   : > { %v589_v9 = vmul.f32 1.442695, %v585_v4  ;;  %v591_v11 = vmul.f32 1.442695, %v586_v5  ;;  %v593_v13 = vmul.f32 1.442695, %v587_v10 }
 0x26c   : > { %v595_v14 = vmul.f32 1.442695, %v588_v12 }
 0x26d   : > { %1201 = vpow2.f32 %v589_v9 }
 0x26e   : > { %1203 = vpow2.f32 %v591_v11 }
 0x26f   : > { %1205 = vpow2.f32 %v593_v13 }
 0x270   : > { %1207 = vpow2.f32 %v595_v14 }
 0x27a   : > { %v1202_v15 = vpop.eup %1201 }
 0x27b   : > { %602 = vperm.xlu1 %1200, %v1202_v15   ;;  %v1204_v16 = vpop.eup %1203 }
 0x27c   : > { %v1206_v17 = vpop.eup %1205 }
 0x27d   : > { %v1208_v18 = vpop.eup %1207 }
 0x27f   : > { %605 = vperm.xlu1 %1200, %v1204_v16  }
 0x283   : > { %608 = vperm.xlu1 %1200, %v1206_v17  }
 0x287   : > { %611 = vperm.xlu1 %1200, %v1208_v18  }
 0x2f6   : > { %v603_v19 = vpop.permute.xlu1 %602 }
 0x2f7   : > { %v616_v24 = vrot.slane %v603_v19, %v1677_v46 }
 0x2fa   : > { %v606_v20 = vpop.permute.xlu1 %605 }
 0x2fb   : > { %v620_v22 = vrot.slane %v606_v20, %v1680_v47 }
 0x2fd   : > { %v621_v27 = vsel %vm556_vm1, %v620_v22, %v616_v24 }
 0x2fe   : > { %v609_v21 = vpop.permute.xlu1 %608 }
 0x2ff   : > { %v625_v25 = vrot.slane %v609_v21, %v1677_v46 }
 0x302   : > { %v612_v23 = vpop.permute.xlu1 %611 }
 0x303   : > { %v629_v26 = vrot.slane %v612_v23, %v1680_v47 }
 0x305   : > { %v630_v28 = vsel %vm556_vm1, %v629_v26, %v625_v25 }
 0x306   : > { %v631_v29 = vsel %vm567_vm2, %v630_v28, %v621_v27 }
 0x307   : > { %v633_v30 = vsel %vm570_vm3, %v631_v29, 0.0 }
 0x308   : > { %634 = vadd.xlane.f32.xlu1 %v633_v30 }
 0x391   : > { %v635_v31 = vpop.xlane.xlu1 %634 }
 0x392   : > { %1209 = vrcp.f32 %v635_v31 }
 0x39f   : > { %v1210_v32 = vpop.eup %1209 }
 0x3a0   : > { %v641_v33 = vrot.slane %v1210_v32, %v577_v62  ;;  %v645_v37 = vrot.slane %v1210_v32, %v581_v63 }
 0x3a2   : > { %v648_v35 = vmul.f32 %v1202_v15, %v641_v33  ;;  %v649_v36 = vmul.f32 %v1204_v16, %v641_v33  ;;  %v650_v38 = vmul.f32 %v1206_v17, %v645_v37  ;;  %v651_v39 = vmul.f32 %v1208_v18, %v645_v37 }
 0x3a4   : > { %655 = vperm.xlu0 %1199, %v648_v35  }
 0x3a8   : > { %658 = vperm.xlu0 %1199, %v649_v36  }
 0x3ac   : > { %745 = vperm.xlu0 %1199, %v650_v38  }
 0x3b0   : > { %748 = vperm.xlu0 %1199, %v651_v39  }
 0x41f   : > { %v656_v40 = vpop.permute.xlu0 %655 }
 0x420   : > { %v663_v42 = vrot.slane %v656_v40, %v1677_v46 }
 0x423   : > { %v659_v41 = vpop.permute.xlu0 %658 }
 0x424   : > { %v667_v6 = vrot.slane %v659_v41, %v1680_v47 }
 0x426   : > { %v668_v45 = vsel %vm556_vm1, %v667_v6, %v663_v42 }
 0x427   : > { %1113 = vmatmul.mubr.msk.f32.vlgmr.msra.gmra.mxu1 %vm669_vm5, %v668_v45  ;;  %v746_v48 = vpop.permute.xlu0 %745 }
 0x428   : > { %1116 = vmatpush3.msra.mxu1 %v1656_v8  ;;  %1119 = vmatprep.mubr.msk.f32.mxu1 %vm1406_vm4, %v1405_v34  ;;  %v753_v51 = vrot.slane %v746_v48, %v1677_v46 }
 0x429   : > { %1117 = vmatprep.subr.mxu1 %v1405_v34 }
 0x42a   : > { %1118 = vmatpush3.msra.mxu1 %v1650_v7 }
 0x42b   : > { %v749_v50 = vpop.permute.xlu0 %748 }
 0x42c   : > { %v757_v52 = vrot.slane %v749_v50, %v1680_v47 }
 0x42e   : > { %v758_v54 = vsel %vm556_vm1, %v757_v52, %v753_v51 }
 0x42f   : > { %v835_v8 = vsel %vm567_vm2, %v758_v54, %v668_v45  ;;  %1120 = vmatmul.mubr.msk.f32.vlgmr.msra.gmra.mxu1 %vm669_vm5, %v758_v54 }
 0x430   : > { %v837_v55 = vsel %vm669_vm5, %v835_v8, 0.0 }
 0x431   : > { %v845_v56 = vrot.slane %v837_v55, %v844_v53 }
 0x433   : > { %v846_v57 = vcombine.high %v845_v56, %v845_v56  ;;  %1065 = vst.sshfl [vmem:[%s364_s18] sm:$0x1 pattern:$0x73625140] %v845_v56 }
 0x435   : > { %1066 = vst.sshfl [vmem:[%s364_s18 + $0x1] sm:$0x1 pattern:$0x73625140] %v846_v57 }
 0x436   : > { %1306 = shalt.err (!%p1303_p10)
}
 0x437   : > { %s1307_s22 = scalar_lea.hbm %s1724_s15, 32  ;;  %s1311_s25 = scalar_lea.hbm %s1815_s7, 64 }
 0x438   : > { %p1308_p1 = scmp.ne.s32.totalorder %s1724_s15, %s1307_s22  ;;  %p1312_p7 = scmp.lt.s32.totalorder %s1724_s15, %s1815_s7 }
 0x439   : > { %p1313_p8 = scmp.lt.s32.totalorder %s1311_s25, %s1307_s22 }
 0x43a   : > { %p1309_p4 = pnand %p1308_p1, %p1840_p9 }
 0x43b   : > { %p1314_p11 = por %p1313_p8, %p1312_p7 }
 0x43c   : > { %p1310_p3 = pneg %p1309_p4 }
 0x43e   : > { %p1315_p6 = pnand %p1314_p11, %p1310_p3 }
 0x440   : > { %1318 = shalt.err (!%p1315_p6)
}
 0x441   : > { %s1409_s18 = smov 16   ;;  %s1410_s11 = smov 1  }
 0x442   : > { %1131 = dma.vmem_to_hbm [thread:$0]  (%p1840_p9), %s1726_s28, 32, %s1724_s15, %s871_s20, %s1409_s18, %s1409_s18, %s1410_s11  }
 0x443   : > { %s357_s12 = scalar_lea.vmem [#allocation9], %s1633_s10  ;;  %s1763_s0 = scalar_lea.hbm %s1814_s6, %s1078_s2 }
 0x444   : > { %s884_s30 = sshll.u32 %s357_s12, 4  ;;  %s866_s10 = scalar_lea.sflag [#allocation5], %s1623_s21  ;;  %s1756_s30 = int_to_ptr.vmem [resolvable:$true] %s884_s30 }
 0x445   : > { %s1319_s15 = scalar_lea.vmem %s1756_s30, 32  ;;  %s1411_s28 = smov [#allocation9]  }
 0x446   : > { %p1320_p12 = scmp.ne.s32.totalorder %s1756_s30, %s1319_s15  ;;  %s1323_s20 = sshll.u32 %s1411_s28, 4  ;;  %s1324_s20 = int_to_ptr.vmem [resolvable:$false] %s1323_s20 }
 0x447   : > { %s1325_s22 = scalar_lea.vmem %s1324_s20, 64  ;;  %p1326_p5 = scmp.lt.s32.totalorder %s1756_s30, %s1324_s20 }
 0x448   : > { %p1321_p13 = pnand %p1320_p12, %p1840_p9  ;;  %p1327_p2 = scmp.lt.s32.totalorder %s1325_s22, %s1319_s15 }
 0x44a   : > { %p1322_p0 = pneg %p1321_p13  ;;  %p1328_p10 = por %p1327_p2, %p1326_p5 }
 0x44c   : > { %p1329_p1 = pnand %p1328_p10, %p1322_p0 }
 0x4e7   : > { %v738_v7 = vpop.f32.mrf.mxu1 }
 0x4e8   : > { %v831_v43 = vsel %vm384_vm0, %v738_v7, 0.0 }
 0x4e9   : > { %833 = vst [vmem:[%s357_s12] sm:$0x1] %v831_v43  ;;  %v1114_v46 = vpop.f32.mrf.mxu1 }
 0x4ef   : > { %v827_v47 = vpop.f32.mrf.mxu1 }
 0x4f0   : > { %v832_v58 = vsel %vm384_vm0, %v827_v47, 0.0 }
 0x4f1   : > { %834 = vst [vmem:[%s357_s12 + $0x1] sm:$0x1] %v832_v58  ;;  %v1121_v59 = vpop.f32.mrf.mxu1 }
 0x4f2   : > { %1332 = shalt.err (!%p1329_p1)
}
 0x4f3   : > { %s1333_s5 = scalar_lea.hbm %s1763_s0, 32  ;;  %s1337_s17 = scalar_lea.hbm %s1814_s6, 64 }
 0x4f4   : > { %p1334_p4 = scmp.ne.s32.totalorder %s1763_s0, %s1333_s5  ;;  %p1338_p8 = scmp.lt.s32.totalorder %s1763_s0, %s1814_s6 }
 0x4f5   : > { %p1339_p11 = scmp.lt.s32.totalorder %s1337_s17, %s1333_s5 }
 0x4f6   : > { %p1335_p3 = pnand %p1334_p4, %p1840_p9 }
 0x4f7   : > { %p1340_p6 = por %p1339_p11, %p1338_p8 }
 0x4f8   : > { %p1336_p7 = pneg %p1335_p3 }
 0x4fa   : > { %p1341_p12 = pnand %p1340_p6, %p1336_p7 }
 0x4fc   : > { %1344 = shalt.err (!%p1341_p12)
}
 0x4fd   : > { %1130 = dma.vmem_to_hbm [thread:$0]  (%p1840_p9), %s1756_s30, 32, %s1763_s0, %s866_s10, %s1409_s18, %s1409_s18, %s1410_s11  }
 0x4fe PF: > { %s915_s13 = sand.u32 1, %s1383_s26   ;;  %p1841_p13 = scmp.ne.s32.totalorder %s1825_s9, 0 }
 0x4ff   : > { %p1842_p0 = scmp.ge.s32.totalorder %s1395_s29, 2  ;;  %s916_s16 = scalar_lea.sflag [#allocation5], %s915_s13 }
 0x501   : > { %p1146_p5 = pnand %p1842_p0, %p1841_p13 }
 0x503   : > { %p1147_p2 = pneg %p1146_p5 }
 0x505   : > { %1374 = dma.done.wait (%p1147_p2), %s916_s16, 32  }
 0x506   : > { %1376 = vsyncadd (%p1147_p2), %s916_s16, 4294967264  ;;  %s925_s12 = scalar_lea.sflag [#allocation11], %s915_s13 }
 0x507   : > { %1378 = dma.done.wait (%p1147_p2), %s925_s12, 32  }
 0x508   : > { %1380 = vsyncadd (%p1147_p2), %s925_s12, 4294967264  ;;  %s1843_s23 = sld [smem:[#allocation17_spill]]  ;;  %p29_p9 = scmp.ge.s32.totalorder %s1509_s14, 4  }
 0x509   : > { %s1844_s28 = sld [smem:[#allocation18_spill]]  ;;  %s1845_s26 = smov %s1387_s27 }
 0x50a   : > { %s1847_s29 = smov %s1509_s14  ;;  %31 = sbr.rel (!%p29_p9) target bundleno = 12 (0xc), region = 123 }
 0x50e   : > { %s1846_s27 = smov %s1843_s23 }
 0x50f   :  { %930 = vsyncpa [#allocation4], 1 }
 0x510   :  { %932 = vsyncpa [#allocation4 + $0x1], 1 }
 0x511   :  { %933 = vsyncpa [#allocation7], 1 }
 0x512   :  { %935 = vsyncpa [#allocation7 + $0x1], 1 }
 0x513   :  { %936 = vsyncpa [#allocation5], 1 }
 0x514   :  { %938 = vsyncpa [#allocation5 + $0x1], 1 }
 0x515   :  { %939 = vsyncpa [#allocation11], 1 }
 0x516   :  { %941 = vsyncpa [#allocation11 + $0x1], 1 }

</bundles_post_ra>
